<compile_context>
chip_gen: v7x
topology: tpu7x:2x2x1
jax: 0.10.0
libtpu: 0.0.40
codegen_flags: <defaults>
</compile_context>

<pallas_src>
import numpy as np

import jax
import jax.numpy as jnp
from jax.experimental import pallas as pl
from jax.experimental.pallas import tpu as pltpu


# ---------------------------------------------------------------------------
# Kernel body: two MXU matmuls + ReLU per (batch, seq-tile) block.
# ---------------------------------------------------------------------------
def _lora_kernel(x_ref, b_ref, a_ref, o_ref):
    x = x_ref[...]                                                        # (tS, D)
    hidden = jnp.dot(x, b_ref[...], preferred_element_type=jnp.float32)  # (tS, H) f32
    hidden = hidden.astype(a_ref.dtype)                                   # back to MXU dtype
    out = jnp.dot(hidden, a_ref[...], preferred_element_type=jnp.float32)  # (tS, D) f32
    o_ref[...] = jnp.maximum(out, 0.0).astype(o_ref.dtype)


# ---------------------------------------------------------------------------
# Per-batch adapter slabs (batch-dependent but sequence-independent weights).
# Hoist / cache the result of this function when adapters are static.
# ---------------------------------------------------------------------------
def prepare_lora_slabs(adapter_b, adapter_a, batch_size, *, compute_dtype=jnp.bfloat16):
    """Build per-batch (D, H) / (H, D) slabs with multiplicity/A weighting.

    Returns (b_slab, a_slab) with shapes (B, D, H) and (B, H, D), H a multiple
    of 128, such that  relu(x[b] @ b_slab[b] @ a_slab[b])  equals the PyTorch
    forward exactly (including the B-not-dividing-A boundary case).
    """
    A, D, r = adapter_b.shape
    B = int(batch_size)

    # Static multiplicity table: flat slot i = b*A + a uses adapter (b*A+a)//B.
    counts = np.zeros((B, A), dtype=np.int64)
    for b in range(B):
        for a in range(A):
            counts[b, (b * A + a) // B] += 1
    lo = np.array([(b * A) // B for b in range(B)], dtype=np.int64)       # adapters used
    g_used = np.array([int((counts[b] > 0).sum()) for b in range(B)])     # are contiguous
    gmax = int(g_used.max())

    h_real = gmax * r
    H = ((h_real + 127) // 128) * 128                                     # lane-pad to 128

    # One batch-independent transpose of the raw (A, D, r) adapters -> (D, A*r)
    # columns ordered [adapter j, rank k]; a_all is a pure reshape (no copy).
    bt = jnp.transpose(adapter_b, (1, 0, 2)).reshape(D, A * r)
    at = adapter_a.reshape(A * r, D)
    pad_cols = max(int(lo.max()) * r + H - A * r, 0)
    if pad_cols:
        bt = jnp.pad(bt, ((0, 0), (0, pad_cols)))
        at = jnp.pad(at, ((0, pad_cols), (0, 0)))

    # Per-column weight = multiplicity / A; zero on unused / padded slots.
    w = np.zeros((B, H), dtype=np.float32)
    for b in range(B):
        for g in range(int(g_used[b])):
            j = int(lo[b]) + g
            w[b, g * r:(g + 1) * r] = counts[b, j] / float(A)

    b_slab = jnp.stack(
        [bt[:, int(lo[b]) * r: int(lo[b]) * r + H] for b in range(B)])            # (B, D, H)
    a_slab = jnp.stack(
        [at[int(lo[b]) * r: int(lo[b]) * r + H, :] * jnp.asarray(w[b])[:, None]
         for b in range(B)])                                                       # (B, H, D)
    return b_slab.astype(compute_dtype), a_slab.astype(compute_dtype)


# ---------------------------------------------------------------------------
# Device-aware sequence-tile / VMEM-budget picker.
# ---------------------------------------------------------------------------
def _pick_tiling(S, D, H, x_bytes, out_bytes, slab_bytes_per_elt, max_seq_tile=None):
    try:
        vmem_cap = int(pltpu.get_tpu_info().vmem_capacity_bytes)
    except Exception:
        vmem_cap = 64 * 1024 * 1024  # conservative default (v7x per-TC VMEM)
    budget = (vmem_cap * 3) // 4                 # ~96 MiB on v5e/v6e, ~48 MiB on v7x
    headroom = 4 * 1024 * 1024                   # Mosaic internal scratch

    slab_bytes = 2 * D * H * slab_bytes_per_elt  # single-buffered B-slab + A-slab
    tile_cap = 8
    for cand in (1024, 512, 256, 128, 64, 32, 16, 8):
        per_tile = 2 * cand * D * (x_bytes + out_bytes)   # double-buffered x + out
        per_tile += cand * (H + D) * 4                     # f32 hidden + f32 result
        if slab_bytes + per_tile + headroom <= budget:
            tile_cap = cand
            break
    if max_seq_tile is not None:
        tile_cap = min(tile_cap, max(8, (int(max_seq_tile) // 8) * 8))

    if S <= tile_cap:
        tS, n_s = S, 1                 # full-extent block (no (8,128) constraint)
    else:
        tS, n_s = tile_cap, pl.cdiv(S, tile_cap)   # ragged last block allowed

    footprint = (slab_bytes + 2 * tS * D * (x_bytes + out_bytes)
                 + tS * (H + D) * 4 + headroom)
    vmem_limit = int(min(budget, max(32 * 1024 * 1024, footprint)))
    return tS, n_s, vmem_limit


# ---------------------------------------------------------------------------
# Public forward.
# ---------------------------------------------------------------------------
def lora_forward(x, adapter_b=None, adapter_a=None, *, compute_dtype=jnp.bfloat16,
                 out_dtype=None, slabs=None, max_seq_tile=None):
    """x: (B, S, D); adapter_b: (A, D, r); adapter_a: (A, r, D) -> (B, S, D)."""
    B, S, D = x.shape
    if slabs is None:
        slabs = prepare_lora_slabs(adapter_b, adapter_a, B, compute_dtype=compute_dtype)
    b_slab, a_slab = slabs
    b_slab = b_slab.astype(compute_dtype)
    a_slab = a_slab.astype(compute_dtype)
    assert b_slab.shape[0] == B and b_slab.shape[1] == D
    H = b_slab.shape[-1]

    if out_dtype is None:
        out_dtype = x.dtype
    x_c = x.astype(compute_dtype)                       # bf16 wrapper cast by default

    elt_c = jnp.dtype(compute_dtype).itemsize
    elt_o = jnp.dtype(out_dtype).itemsize
    tS, n_s, vmem_limit = _pick_tiling(S, D, H, elt_c, elt_o, elt_c, max_seq_tile)

    if B == 1:
        # Collapse to a 1-D grid over sequence tiles so a degenerate batch axis
        # never starves the second v7x TensorCore.
        grid = (n_s,)
        x_map = lambda s: (0, s, 0)
        slab_map = lambda s: (0, 0, 0)
        dims = ("parallel",)
    else:
        grid = (B, n_s)
        x_map = lambda b, s: (b, s, 0)
        slab_map = lambda b, s: (b, 0, 0)
        dims = ("parallel", "parallel")

    def run(single_buffer_slabs):
        slab_kwargs = {"pipeline_mode": pl.Buffered(1)} if single_buffer_slabs else {}
        in_specs = [
            pl.BlockSpec((pl.Squeezed(), tS, D), x_map),                     # x tile
            pl.BlockSpec((pl.Squeezed(), D, H), slab_map, **slab_kwargs),    # B slab
            pl.BlockSpec((pl.Squeezed(), H, D), slab_map, **slab_kwargs),    # A slab
        ]
        out_spec = pl.BlockSpec((pl.Squeezed(), tS, D), x_map)
        return pl.pallas_call(
            _lora_kernel,
            out_shape=jax.ShapeDtypeStruct((B, S, D), out_dtype),
            grid=grid,
            in_specs=in_specs,
            out_specs=out_spec,
            compiler_params=pltpu.CompilerParams(
                dimension_semantics=dims,
                vmem_limit_bytes=vmem_limit,
            ),
        )(x_c, b_slab, a_slab)

    try:
        # S-invariant slabs only need one buffer; frees VMEM for larger tS.
        return run(True)
    except Exception:
        # Fallback for jax versions that reject single-buffered BlockSpecs.
        return run(False)


# ---------------------------------------------------------------------------
# Pure-JAX replication of the exact PyTorch forward (semantic anchor).
# ---------------------------------------------------------------------------
def lora_reference(x, adapter_b, adapter_a):
    B, S, D = x.shape
    A, _, r = adapter_b.shape
    inputs = jnp.broadcast_to(x[:, None], (B, A, S, D)).reshape(B * A, S, D)
    bs = jnp.broadcast_to(adapter_b[:, None], (A, B, D, r)).reshape(B * A, D, r)
    as_ = jnp.broadcast_to(adapter_a[:, None], (A, B, r, D)).reshape(B * A, r, D)
    hidden = jnp.einsum("nsd,ndr->nsr", inputs, bs)
    out = jnp.einsum("nsr,nrd->nsd", hidden, as_)
    out = out.reshape(B, A, S, D).mean(axis=1)
    return jnp.maximum(out, 0.0)


if __name__ == "__main__":
    batch, seq, d_model = 2, 8, 32
    rank, num_adapters = 4, 32

    key = jax.random.PRNGKey(0)
    kx, kb, ka = jax.random.split(key, 3)
    x = jax.random.normal(kx, (batch, seq, d_model), dtype=jnp.float32)
    adapter_b = jax.random.normal(kb, (num_adapters, d_model, rank), dtype=jnp.float32)
    adapter_a = jax.random.normal(ka, (num_adapters, rank, d_model), dtype=jnp.float32)

    ref = lora_reference(x, adapter_b, adapter_a)

    # 1) Exact-semantics check on the f32 compute path.
    out_f32 = jax.block_until_ready(
        lora_forward(x, adapter_b, adapter_a, compute_dtype=jnp.float32))
    assert out_f32.shape == (batch, seq, d_model)
    assert jnp.allclose(out_f32, ref, atol=1e-4, rtol=1e-4), "f32 path mismatch"

    # 2) Default bf16 compute path (f32 accumulation): loosened tolerance since
    #    x / slabs / the inter-matmul hidden are bf16.
    out_bf16 = jax.block_until_ready(lora_forward(x, adapter_b, adapter_a))
    assert jnp.allclose(out_bf16, ref, atol=1.5e-1, rtol=1e-1), "bf16 path mismatch"

    # 3) Boundary case: batch does NOT divide num_adapters (multiplicity weights).
    x3 = jax.random.normal(jax.random.PRNGKey(1), (3, seq, d_model), dtype=jnp.float32)
    ref3 = lora_reference(x3, adapter_b, adapter_a)
    out3 = jax.block_until_ready(
        lora_forward(x3, adapter_b, adapter_a, compute_dtype=jnp.float32))
    assert jnp.allclose(out3, ref3, atol=1e-4, rtol=1e-4), "B !| A mismatch"

    # 4) batch == 1 path (1-D grid over sequence tiles).
    x1 = jax.random.normal(jax.random.PRNGKey(2), (1, seq, d_model), dtype=jnp.float32)
    ref1 = lora_reference(x1, adapter_b, adapter_a)
    out1 = jax.block_until_ready(
        lora_forward(x1, adapter_b, adapter_a, compute_dtype=jnp.float32))
    assert jnp.allclose(out1, ref1, atol=1e-4, rtol=1e-4), "B==1 mismatch"

    # 5) Ragged sequence tiling (cdiv grid, last block masked): S=20 with tS=8.
    x4 = jax.random.normal(jax.random.PRNGKey(3), (2, 20, d_model), dtype=jnp.float32)
    ref4 = lora_reference(x4, adapter_b, adapter_a)
    out4 = jax.block_until_ready(
        lora_forward(x4, adapter_b, adapter_a, compute_dtype=jnp.float32,
                     max_seq_tile=8))
    assert jnp.allclose(out4, ref4, atol=1e-4, rtol=1e-4), "ragged-S mismatch"

    print("KERNEL_OK")
</pallas_src>

<mosaic_0001>
module attributes {stable_mosaic.version = 11 : i64} {
  func.func @_lora_kernel(%arg0: i32, %arg1: i32, %arg2: memref<1x8x32xf32, #tpu.memory_space<vmem>>, %arg3: memref<1x32x128xf32, #tpu.memory_space<vmem>>, %arg4: memref<1x128x32xf32, #tpu.memory_space<vmem>>, %arg5: memref<1x8x32xf32, #tpu.memory_space<vmem>>) attributes {dimension_semantics = [#tpu.dimension_semantics<parallel>, #tpu.dimension_semantics<parallel>], iteration_bounds = array<i64: 2, 1>, scalar_prefetch = 0 : i64, scratch_operands = 0 : i64, tpu.core_type = #tpu.core_type<tc>, window_params = [{transform_indices = @transform_0, window_bounds = array<i64: 1, 8, 32>}, {pipeline_mode = #tpu.pipeline_mode<synchronous>, transform_indices = @transform_1, window_bounds = array<i64: 1, 32, 128>}, {pipeline_mode = #tpu.pipeline_mode<synchronous>, transform_indices = @transform_2, window_bounds = array<i64: 1, 128, 32>}, {transform_indices = @transform_3, window_bounds = array<i64: 1, 8, 32>}]} {
    %c0 = arith.constant 0 : index
    %c0_0 = arith.constant 0 : index
    %c0_1 = arith.constant 0 : index
    %0 = vector.load %arg2[%c0, %c0_0, %c0_1] : memref<1x8x32xf32, #tpu.memory_space<vmem>>, vector<1x8x32xf32>
    %1 = vector.shape_cast %0 : vector<1x8x32xf32> to vector<8x32xf32>
    %c0_2 = arith.constant 0 : index
    %c0_3 = arith.constant 0 : index
    %c0_4 = arith.constant 0 : index
    %2 = vector.load %arg3[%c0_2, %c0_3, %c0_4] : memref<1x32x128xf32, #tpu.memory_space<vmem>>, vector<1x32x128xf32>
    %3 = vector.shape_cast %2 : vector<1x32x128xf32> to vector<32x128xf32>
    %cst = arith.constant dense<0.000000e+00> : vector<8x128xf32>
    %4 = tpu.matmul %1, %3, %cst {dimension_numbers = #tpu.dot_dimension_numbers<[1], [0], [0], [1], [0, 0, 1, 1], [], []>} : vector<8x32xf32>, vector<32x128xf32>, vector<8x128xf32> -> vector<8x128xf32>
    %c0_5 = arith.constant 0 : index
    %c0_6 = arith.constant 0 : index
    %c0_7 = arith.constant 0 : index
    %5 = vector.load %arg4[%c0_5, %c0_6, %c0_7] : memref<1x128x32xf32, #tpu.memory_space<vmem>>, vector<1x128x32xf32>
    %6 = vector.shape_cast %5 : vector<1x128x32xf32> to vector<128x32xf32>
    %cst_8 = arith.constant dense<0.000000e+00> : vector<8x32xf32>
    %7 = tpu.matmul %4, %6, %cst_8 {dimension_numbers = #tpu.dot_dimension_numbers<[1], [0], [0], [1], [0, 0, 1, 1], [], []>} : vector<8x128xf32>, vector<128x32xf32>, vector<8x32xf32> -> vector<8x32xf32>
    %cst_9 = arith.constant 0.000000e+00 : f32
    %8 = vector.broadcast %cst_9 : f32 to vector<8x32xf32>
    %9 = arith.maximumf %7, %8 : vector<8x32xf32>
    %c0_10 = arith.constant 0 : index
    %c0_11 = arith.constant 0 : index
    %c0_12 = arith.constant 0 : index
    %10 = vector.load %arg5[%c0_10, %c0_11, %c0_12] : memref<1x8x32xf32, #tpu.memory_space<vmem>>, vector<1x8x32xf32>
    %11 = vector.shape_cast %10 : vector<1x8x32xf32> to vector<8x32xf32>
    %12 = vector.shape_cast %9 : vector<8x32xf32> to vector<1x8x32xf32>
    tpu.vector_store %arg5[%c0_10, %c0_11, %c0_12], %12 {strides = array<i32>} : memref<1x8x32xf32, #tpu.memory_space<vmem>>, vector<1x8x32xf32>,
    return
  }
  func.func @transform_0(%arg0: i32, %arg1: i32) -> (i32, i32, i32) {
    %c0_i32 = arith.constant 0 : i32
    %c0_i32_0 = arith.constant 0 : i32
    return %arg0, %arg1, %c0_i32 : i32, i32, i32
  }
  func.func @transform_1(%arg0: i32, %arg1: i32) -> (i32, i32, i32) {
    %c0_i32 = arith.constant 0 : i32
    %c0_i32_0 = arith.constant 0 : i32
    %c0_i32_1 = arith.constant 0 : i32
    return %arg0, %c0_i32, %c0_i32_0 : i32, i32, i32
  }
  func.func @transform_2(%arg0: i32, %arg1: i32) -> (i32, i32, i32) {
    %c0_i32 = arith.constant 0 : i32
    %c0_i32_0 = arith.constant 0 : i32
    %c0_i32_1 = arith.constant 0 : i32
    return %arg0, %c0_i32, %c0_i32_0 : i32, i32, i32
  }
  func.func @transform_3(%arg0: i32, %arg1: i32) -> (i32, i32, i32) {
    %c0_i32 = arith.constant 0 : i32
    %c0_i32_0 = arith.constant 0 : i32
    return %arg0, %arg1, %c0_i32 : i32, i32, i32
  }
}

module attributes {stable_mosaic.version = 11 : i64} {
  func.func @_lora_kernel(%arg0: i32, %arg1: i32, %arg2: memref<1x8x32xf32, #tpu.memory_space<vmem>>, %arg3: memref<1x32x128xf32, #tpu.memory_space<vmem>>, %arg4: memref<1x128x32xf32, #tpu.memory_space<vmem>>, %arg5: memref<1x8x32xf32, #tpu.memory_space<vmem>>) attributes {dimension_semantics = [#tpu.dimension_semantics<parallel>, #tpu.dimension_semantics<parallel>], iteration_bounds = array<i64: 2, 1>, scalar_prefetch = 0 : i64, scratch_operands = 0 : i64, tpu.core_type = #tpu.core_type<tc>, window_params = [{transform_indices = @transform_0, window_bounds = array<i64: 1, 8, 32>}, {transform_indices = @transform_1, window_bounds = array<i64: 1, 32, 128>}, {transform_indices = @transform_2, window_bounds = array<i64: 1, 128, 32>}, {transform_indices = @transform_3, window_bounds = array<i64: 1, 8, 32>}]} {
    %c0 = arith.constant 0 : index
    %c0_0 = arith.constant 0 : index
    %c0_1 = arith.constant 0 : index
    %0 = vector.load %arg2[%c0, %c0_0, %c0_1] : memref<1x8x32xf32, #tpu.memory_space<vmem>>, vector<1x8x32xf32>
    %1 = vector.shape_cast %0 : vector<1x8x32xf32> to vector<8x32xf32>
    %c0_2 = arith.constant 0 : index
    %c0_3 = arith.constant 0 : index
    %c0_4 = arith.constant 0 : index
    %2 = vector.load %arg3[%c0_2, %c0_3, %c0_4] : memref<1x32x128xf32, #tpu.memory_space<vmem>>, vector<1x32x128xf32>
    %3 = vector.shape_cast %2 : vector<1x32x128xf32> to vector<32x128xf32>
    %cst = arith.constant dense<0.000000e+00> : vector<8x128xf32>
    %4 = tpu.matmul %1, %3, %cst {dimension_numbers = #tpu.dot_dimension_numbers<[1], [0], [0], [1], [0, 0, 1, 1], [], []>} : vector<8x32xf32>, vector<32x128xf32>, vector<8x128xf32> -> vector<8x128xf32>
    %c0_5 = arith.constant 0 : index
    %c0_6 = arith.constant 0 : index
    %c0_7 = arith.constant 0 : index
    %5 = vector.load %arg4[%c0_5, %c0_6, %c0_7] : memref<1x128x32xf32, #tpu.memory_space<vmem>>, vector<1x128x32xf32>
    %6 = vector.shape_cast %5 : vector<1x128x32xf32> to vector<128x32xf32>
    %cst_8 = arith.constant dense<0.000000e+00> : vector<8x32xf32>
    %7 = tpu.matmul %4, %6, %cst_8 {dimension_numbers = #tpu.dot_dimension_numbers<[1], [0], [0], [1], [0, 0, 1, 1], [], []>} : vector<8x128xf32>, vector<128x32xf32>, vector<8x32xf32> -> vector<8x32xf32>
    %cst_9 = arith.constant 0.000000e+00 : f32
    %8 = vector.broadcast %cst_9 : f32 to vector<8x32xf32>
    %9 = arith.maximumf %7, %8 : vector<8x32xf32>
    %c0_10 = arith.constant 0 : index
    %c0_11 = arith.constant 0 : index
    %c0_12 = arith.constant 0 : index
    %10 = vector.load %arg5[%c0_10, %c0_11, %c0_12] : memref<1x8x32xf32, #tpu.memory_space<vmem>>, vector<1x8x32xf32>
    %11 = vector.shape_cast %10 : vector<1x8x32xf32> to vector<8x32xf32>
    %12 = vector.shape_cast %9 : vector<8x32xf32> to vector<1x8x32xf32>
    tpu.vector_store %arg5[%c0_10, %c0_11, %c0_12], %12 {strides = array<i32>} : memref<1x8x32xf32, #tpu.memory_space<vmem>>, vector<1x8x32xf32>,
    return
  }
  func.func @transform_0(%arg0: i32, %arg1: i32) -> (i32, i32, i32) {
    %c0_i32 = arith.constant 0 : i32
    %c0_i32_0 = arith.constant 0 : i32
    return %arg0, %arg1, %c0_i32 : i32, i32, i32
  }
  func.func @transform_1(%arg0: i32, %arg1: i32) -> (i32, i32, i32) {
    %c0_i32 = arith.constant 0 : i32
    %c0_i32_0 = arith.constant 0 : i32
    %c0_i32_1 = arith.constant 0 : i32
    return %arg0, %c0_i32, %c0_i32_0 : i32, i32, i32
  }
  func.func @transform_2(%arg0: i32, %arg1: i32) -> (i32, i32, i32) {
    %c0_i32 = arith.constant 0 : i32
    %c0_i32_0 = arith.constant 0 : i32
    %c0_i32_1 = arith.constant 0 : i32
    return %arg0, %c0_i32, %c0_i32_0 : i32, i32, i32
  }
  func.func @transform_3(%arg0: i32, %arg1: i32) -> (i32, i32, i32) {
    %c0_i32 = arith.constant 0 : i32
    %c0_i32_0 = arith.constant 0 : i32
    return %arg0, %arg1, %c0_i32 : i32, i32, i32
  }
}

</mosaic_0001>

<bundles_post_ra>
// kernel: tpu_custom_call.1
= control target key start
LH: loop header
LB: loop body
LE: loop exit
PB: predicated region body
PF: predicated region fallthrough
CT: control target
= control target key end

     0   :  { %8 = vsyncpa [#allocation3], 0  ;;  %s940_s0 = inlined_call_operand.vmem [shape: f32[2,8,32], index: 0, kind: input, shape index: {}]   ;;  %s941_s1 = inlined_call_operand.vmem [shape: f32[2,32,128], index: 1, kind: input, shape index: {}]   ;;  %s942_s2 = inlined_call_operand.vmem [shape: f32[2,128,32], index: 2, kind: input, shape index: {}]   ;;  %s943_s3 = inlined_call_operand.hbm [shape: f32[2,8,32], index: 3, kind: output, shape index: {}]  }
   0x1   :  { %10 = vsyncpa [#allocation3 + $0x1], 0  ;;  %s792_s12 = smov 0   ;;  %s794_s13 = smov 0  }
   0x2   :  { %s796_s14 = smov 0   ;;  %s798_s15 = smov 0  }
   0x3   :  { %s800_s16 = smov 0   ;;  %s802_s17 = smov 0  }
   0x4 LB: > { %s514_s18 = sadd.s32 4294967295, %s766_s17   ;;  %s515_s19 = sadd.s32 4294967294, %s766_s17   ;;  %s766_s17 = sphi %s802_s17, %s16_s17   ;;  %s762_s16 = sphi %s800_s16, %s950_s16   ;;  %s758_s15 = sphi %s798_s15, %s949_s15   ;;  %s754_s14 = sphi %s796_s14, %s948_s14   ;;  %s750_s13 = sphi %s794_s13, %s947_s13   ;;  %s746_s12 = sphi %s792_s12, %s946_s12  }
   0x5   : > { %s28_s20 = sadd.s32 1, %s762_s16  ;;  %s117_s21 = sadd.s32 1, %s754_s14 }
   0x6   : > { %p30_p0 = scmp.ge.s32.totalorder %s28_s20, 2  ;;  %p127_p1 = scmp.ne.s32.totalorder %s754_s14, %s750_s13 }
   0x7   : > { %p128_p2 = scmp.eq.s32.totalorder %s514_s18, 1  ;;  %p133_p3 = scmp.ne.s32.totalorder %s750_s13, %s746_s12 }
   0x8   : > { %s952_s20 = smov (%p30_p0, %s28_s20), 0  ;;  %p134_p5 = scmp.eq.s32.totalorder %s515_s19, 1 }
   0x9   : > { %p832_p4 = por %p128_p2, %p127_p1  ;;  %s112_s23 = ssub.s32 %s762_s16, %s952_s20 }
   0xa   : > { %p518_p6 = scmp.ge.s32.totalorder %s766_s17, 1  ;;  %p115_p7 = scmp.eq.s32.totalorder %s112_s23, 0 }
   0xb   : > { %p839_p8 = por %p134_p5, %p133_p3  ;;  %p178_p9 = scmp.lt.s32.totalorder %s766_s17, 3 }
   0xc   : > { %s845_s25 = scalar_select %p115_p7, %s754_s14, %s117_s21  }
   0xd   : > { %p179_p10 = pnand %p518_p6, %p178_p9 }
   0xe   : > { %p214_p11 = scmp.lt.s32.totalorder (!%p179_p10), %s758_s15, 1  ;;  %v768_v0 = vmov (!%p179_p10), 0.0|0.0   ;;  %vm769_vm0 = vmmov (!%p179_p10), 0   ;;  %v770_v1 = vmov (!%p179_p10), 0.0   ;;  %vm236_vm1 = vcmask (!%p179_p10), 261120   ;;  %s211_s18 = sand.u32 (!%p179_p10), 1, %s750_s13  }
   0xf   : > { %182 = sbr.rel (%p179_p10) target bundleno = 476 (0x1dc), region = 32  ;;  %600 = vmatprep.subr.bf16.mxu0 (!%p179_p10), %v768_v0  ;;  %562 = vmatprep.mubr.msk.f32.mxu0 (!%p179_p10), %vm769_vm0, %v770_v1  ;;  %s519_s19 = sshll.u32 (!%p179_p10), %s211_s18, 3 }
  0x10   : > { %606 = vmatprep.subr.bf16.mxu1 (!%p179_p10), %v768_v0  ;;  %597 = vmatprep.mubr.msk.f32.mxu1 (!%p179_p10), %vm769_vm0, %v770_v1  ;;  %s527_s21 = sshll.u32 (!%p179_p10), %s758_s15, 7  ;;  %s213_s23 = scalar_lea.vmem (!%p179_p10), [#allocation2], %s519_s19 }
  0x11   : > { %s892_s29 = scalar_lea.hbm (!%p179_p10), %s943_s3, %s527_s21  ;;  %s399_s30 = scalar_lea.sflag (!%p179_p10), [#allocation3], %s211_s18 }
  0x16   : > { %s215_s26 = scalar_select %p214_p11, %s758_s15, 1 }
  0x17   : > { %s771_s15 = smov [#allocation2]  }
  0x18   : > { %s530_s27 = sshll.u32 %s215_s26, 5  ;;  %s531_s28 = sshll.u32 %s215_s26, 7 }
  0x19   : > { %s225_s4 = scalar_lea.vmem %s941_s1, %s530_s27  ;;  %s857_s7 = scalar_lea.vmem %s942_s2, %s531_s28 }
  0x1a   : > { %v232_v2 = vld [vmem:[%s225_s4] sm:$0xff]  ;;  %v233_v3 = vld [vmem:[%s225_s4 + $0x8] sm:$0xff]  ;;  %v234_v4 = vld [vmem:[%s225_s4 + $0x10] sm:$0xff]  ;;  %s520_s8 = sshll.u32 %s215_s26, 3  ;;  %s413_s26 = sshll.u32 %s213_s23, 4  ;;  %s894_s26 = int_to_ptr.vmem [resolvable:$true] %s413_s26 }
  0x1b   : > { %v601_v5 = vpack.c.bf16 %v233_v3, %v232_v2  ;;  %v235_v6 = vld [vmem:[%s225_s4 + $0x18] sm:$0xff]  ;;  %v310_v7 = vld [vmem:[%s857_s7] sm:$0xff]  ;;  %v311_v8 = vld [vmem:[%s857_s7 + $0x8] sm:$0xff]  ;;  %s220_s11 = scalar_lea.vmem %s940_s0, %s520_s8  ;;  %s688_s4 = scalar_lea.vmem %s894_s26, 128 }
  0x1c   : > { %v607_v9 = vpack.c.bf16 %v311_v8, %v310_v7  ;;  %v312_v10 = vld [vmem:[%s857_s7 + $0x10] sm:$0xff]  ;;  %v313_v11 = vld [vmem:[%s857_s7 + $0x18] sm:$0xff]  ;;  %v604_v12 = vpack.c.bf16 %v235_v6, %v234_v4  ;;  %v314_v14 = vld [vmem:[%s857_s7 + $0x20] sm:$0xff]  ;;  %p689_p12 = scmp.ne.s32.totalorder %s894_s26, %s688_s4  ;;  %s692_s5 = sshll.u32 %s771_s15, 4  ;;  %s693_s5 = int_to_ptr.vmem [resolvable:$false] %s692_s5 }
  0x1d   : > { %602 = vmatpush3.bf16.msra.mxu0 %v601_v5  ;;  %v610_v13 = vpack.c.bf16 %v313_v11, %v312_v10  ;;  %v315_v15 = vld [vmem:[%s857_s7 + $0x28] sm:$0xff]  ;;  %v231_v16 = vld [vmem:[%s220_s11] sm:$0xff]  ;;  %v316_v18 = vld [vmem:[%s857_s7 + $0x30] sm:$0xff]  ;;  %s694_s6 = scalar_lea.vmem %s693_s5, 256  ;;  %p695_p1 = scmp.lt.s32.totalorder %s894_s26, %s693_s5 }
  0x1e   : > { %603 = vmatprep.subr.bf16.mxu0 %v768_v0  ;;  %608 = vmatpush3.bf16.msra.mxu1 %v607_v9  ;;  %v613_v17 = vpack.c.bf16 %v315_v15, %v314_v14  ;;  %v317_v19 = vld [vmem:[%s857_s7 + $0x38] sm:$0xff]  ;;  %v318_v21 = vld [vmem:[%s857_s7 + $0x40] sm:$0xff]  ;;  %v319_v22 = vld [vmem:[%s857_s7 + $0x48] sm:$0xff]  ;;  %p690_p13 = pnand %p689_p12, %p832_p4  ;;  %p696_p2 = scmp.lt.s32.totalorder %s694_s6, %s688_s4 }
  0x1f   : > { %609 = vmatprep.subr.bf16.mxu1 %v768_v0  ;;  %v616_v20 = vpack.c.bf16 %v317_v19, %v316_v18  ;;  %v619_v23 = vpack.c.bf16 %v319_v22, %v318_v21  ;;  %v320_v24 = vld [vmem:[%s857_s7 + $0x50] sm:$0xff]  ;;  %v321_v25 = vld [vmem:[%s857_s7 + $0x58] sm:$0xff]  ;;  %v322_v27 = vld [vmem:[%s857_s7 + $0x60] sm:$0xff] }
  0x20   : > { %v622_v26 = vpack.c.bf16 %v321_v25, %v320_v24  ;;  %v323_v28 = vld [vmem:[%s857_s7 + $0x68] sm:$0xff]  ;;  %v324_v30 = vld [vmem:[%s857_s7 + $0x70] sm:$0xff]  ;;  %v325_v31 = vld [vmem:[%s857_s7 + $0x78] sm:$0xff]  ;;  %p691_p0 = pneg %p690_p13  ;;  %p697_p3 = por %p696_p2, %p695_p1 }
  0x21   : > { %605 = vmatpush3.bf16.msra.mxu0 %v604_v12  ;;  %v625_v29 = vpack.c.bf16 %v323_v28, %v322_v27  ;;  %v628_v32 = vpack.c.bf16 %v325_v31, %v324_v30 }
  0x22   : > { %611 = vmatpush3.bf16.msra.mxu1 %v610_v13  ;;  %p698_p5 = pnand %p697_p3, %p691_p0 }
  0x23   : > { %612 = vmatprep.subr.bf16.mxu1 %v768_v0 }
  0x24   : > { %563 = vmatmul.mubr.msk.f32.vlgmr.msra.gmra.mrb[0].mxu0 %vm236_vm1, %v231_v16 }
  0x26   : > { %614 = vmatpush3.bf16.msra.mxu1 %v613_v17 }
  0x27   : > { %615 = vmatprep.subr.bf16.mxu1 %v768_v0 }
  0x2a   : > { %617 = vmatpush3.bf16.msra.mxu1 %v616_v20 }
  0x2b   : > { %618 = vmatprep.subr.bf16.mxu1 %v768_v0 }
  0x2e   : > { %620 = vmatpush3.bf16.msra.mxu1 %v619_v23 }
  0x2f   : > { %621 = vmatprep.subr.bf16.mxu1 %v768_v0 }
  0x32   : > { %623 = vmatpush3.bf16.msra.mxu1 %v622_v26 }
  0x33   : > { %624 = vmatprep.subr.bf16.mxu1 %v768_v0 }
  0x36   : > { %626 = vmatpush3.bf16.msra.mxu1 %v625_v29 }
  0x37   : > { %627 = vmatprep.subr.bf16.mxu1 %v768_v0 }
  0x3a   : > { %629 = vmatpush3.bf16.msra.mxu1 %v628_v32 }
  0xf7   : > { %v306_v33 = vpop.f32.mrb[0].mxu0 }
  0xf8   : > { %v564_v34 = vpop.f32.mrb[1].mxu0  ;;  %598 = vmatmul.mubr.f32.vlgmr.msra.gmra.mrb[0].mxu1 %v306_v33 }
 0x1cb   : > { %v392_v35 = vpop.f32.mrb[0].mxu1 }
 0x1cc   : > { %v396_v36 = vmax.f32 %v392_v35, 0.0  ;;  %v599_v37 = vpop.f32.mrb[1].mxu1 }
 0x1ce   : > { %397 = vst.msk [vmem:[%s213_s23] sm:$0xff] %vm236_vm1, %v396_v36 }
 0x1cf   : > { %701 = shalt.err (!%p698_p5)
}
 0x1d0   : > { %s702_s7 = scalar_lea.hbm %s892_s29, 128  ;;  %s706_s10 = scalar_lea.hbm %s943_s3, 256 }
 0x1d1   : > { %p703_p6 = scmp.ne.s32.totalorder %s892_s29, %s702_s7  ;;  %p707_p10 = scmp.lt.u32.totalorder %s892_s29, %s943_s3 }
 0x1d2   : > { %p708_p11 = scmp.lt.u32.totalorder %s706_s10, %s702_s7  ;;  %p710_p13 = scmp.lt.u32.totalorder %s702_s7, %s892_s29 }
 0x1d3   : > { %p704_p7 = pnand %p703_p6, %p832_p4 }
 0x1d4   : > { %p709_p12 = por %p708_p11, %p707_p10 }
 0x1d5   : > { %p705_p9 = pneg %p704_p7 }
 0x1d6   : > { %p711_p0 = por %p710_p13, %p709_p12 }
 0x1d8   : > { %p712_p1 = pnand %p711_p0, %p705_p9 }
 0x1da   : > { %715 = shalt.err (!%p712_p1)
}
 0x1db   : > { %630 = dma.vmem_to_hbm [thread:$0]  (%p832_p4), %s894_s26, 128, %s892_s29, %s399_s30  }
 0x1dc PF: > { %p636_p2 = scmp.ge.s32.totalorder %s766_s17, 2  ;;  %s425_s19 = sand.u32 1, %s746_s12  }
 0x1dd   : > { %s426_s21 = scalar_lea.sflag [#allocation3], %s425_s19 }
 0x1de   : > { %p633_p3 = pnand %p636_p2, %p839_p8 }
 0x1e0   : > { %741 = dma.done.wait (!%p633_p3), %s426_s21, 128  }
 0x1e1   : > { %743 = vsyncadd (!%p633_p3), %s426_s21, 4294967168  ;;  %s16_s17 = sadd.s32 1, %s766_s17   ;;  %s946_s12 = smov %s750_s13 }
 0x1e2   : > { %p13_p5 = scmp.ge.s32.totalorder %s16_s17, 4   ;;  %s947_s13 = smov %s754_s14 }
 0x1e3   : > { %s948_s14 = smov %s845_s25  ;;  %s949_s15 = smov %s762_s16 }
 0x1e4   : > { %s950_s16 = smov %s952_s20  ;;  %15 = sbr.rel (!%p13_p5) target bundleno = 4 (0x4), region = 73 }
 0x1eb   :  { %431 = vsyncpa [#allocation3], 1 }
 0x1ec   :  { %433 = vsyncpa [#allocation3 + $0x1], 1 }

// kernel: tpu_custom_call.1
= control target key start
LH: loop header
LB: loop body
LE: loop exit
PB: predicated region body
PF: predicated region fallthrough
CT: control target
= control target key end

     0   :  { %8 = vsyncpa [#allocation3], 0  ;;  %s934_s0 = inlined_call_operand.vmem [shape: f32[2,8,32], index: 0, kind: input, shape index: {}]   ;;  %s935_s1 = inlined_call_operand.vmem [shape: f32[2,32,128], index: 1, kind: input, shape index: {}]   ;;  %s936_s2 = inlined_call_operand.vmem [shape: f32[2,128,32], index: 2, kind: input, shape index: {}]   ;;  %s937_s3 = inlined_call_operand.hbm [shape: f32[2,8,32], index: 3, kind: output, shape index: {}]  }
   0x1   :  { %10 = vsyncpa [#allocation3 + $0x1], 0  ;;  %s786_s12 = smov 0   ;;  %s788_s13 = smov 0  }
   0x2   :  { %s790_s14 = smov 0   ;;  %s792_s15 = smov 0  }
   0x3   :  { %s794_s16 = smov 0   ;;  %s796_s17 = smov 0  }
   0x4 LB: > { %s508_s18 = sadd.s32 4294967295, %s760_s17   ;;  %s509_s19 = sadd.s32 4294967294, %s760_s17   ;;  %s760_s17 = sphi %s796_s17, %s16_s17   ;;  %s756_s16 = sphi %s794_s16, %s944_s16   ;;  %s752_s15 = sphi %s792_s15, %s943_s15   ;;  %s748_s14 = sphi %s790_s14, %s942_s14   ;;  %s744_s13 = sphi %s788_s13, %s941_s13   ;;  %s740_s12 = sphi %s786_s12, %s940_s12  }
   0x5   : > { %s28_s20 = sadd.s32 1, %s756_s16  ;;  %s117_s21 = sadd.s32 1, %s748_s14 }
   0x6   : > { %p30_p0 = scmp.ge.s32.totalorder %s28_s20, 2  ;;  %p127_p1 = scmp.ne.s32.totalorder %s748_s14, %s744_s13 }
   0x7   : > { %p128_p2 = scmp.eq.s32.totalorder %s508_s18, 1  ;;  %p133_p3 = scmp.ne.s32.totalorder %s744_s13, %s740_s12 }
   0x8   : > { %s946_s20 = smov (%p30_p0, %s28_s20), 0  ;;  %p134_p5 = scmp.eq.s32.totalorder %s509_s19, 1 }
   0x9   : > { %p826_p4 = por %p128_p2, %p127_p1  ;;  %s112_s23 = ssub.s32 %s756_s16, %s946_s20 }
   0xa   : > { %p512_p6 = scmp.ge.s32.totalorder %s760_s17, 1  ;;  %p115_p7 = scmp.eq.s32.totalorder %s112_s23, 0 }
   0xb   : > { %p833_p8 = por %p134_p5, %p133_p3  ;;  %p178_p9 = scmp.lt.s32.totalorder %s760_s17, 3 }
   0xc   : > { %s839_s25 = scalar_select %p115_p7, %s748_s14, %s117_s21  }
   0xd   : > { %p179_p10 = pnand %p512_p6, %p178_p9 }
   0xe   : > { %p214_p11 = scmp.lt.s32.totalorder (!%p179_p10), %s752_s15, 1  ;;  %v762_v0 = vmov (!%p179_p10), 0.0|0.0   ;;  %vm763_vm0 = vmmov (!%p179_p10), 0   ;;  %v764_v1 = vmov (!%p179_p10), 0.0   ;;  %vm236_vm1 = vcmask (!%p179_p10), 261120   ;;  %s211_s18 = sand.u32 (!%p179_p10), 1, %s744_s13  }
   0xf   : > { %182 = sbr.rel (%p179_p10) target bundleno = 476 (0x1dc), region = 32  ;;  %594 = vmatprep.subr.bf16.mxu0 (!%p179_p10), %v762_v0  ;;  %556 = vmatprep.mubr.msk.f32.mxu0 (!%p179_p10), %vm763_vm0, %v764_v1  ;;  %s513_s19 = sshll.u32 (!%p179_p10), %s211_s18, 3 }
  0x10   : > { %600 = vmatprep.subr.bf16.mxu1 (!%p179_p10), %v762_v0  ;;  %591 = vmatprep.mubr.msk.f32.mxu1 (!%p179_p10), %vm763_vm0, %v764_v1  ;;  %s521_s21 = sshll.u32 (!%p179_p10), %s752_s15, 7  ;;  %s213_s23 = scalar_lea.vmem (!%p179_p10), [#allocation2], %s513_s19 }
  0x11   : > { %s886_s29 = scalar_lea.hbm (!%p179_p10), %s937_s3, %s521_s21  ;;  %s399_s30 = scalar_lea.sflag (!%p179_p10), [#allocation3], %s211_s18 }
  0x16   : > { %s215_s26 = scalar_select %p214_p11, %s752_s15, 1 }
  0x17   : > { %s765_s15 = smov [#allocation2]  }
  0x18   : > { %s524_s27 = sshll.u32 %s215_s26, 5  ;;  %s525_s28 = sshll.u32 %s215_s26, 7 }
  0x19   : > { %s225_s4 = scalar_lea.vmem %s935_s1, %s524_s27  ;;  %s851_s7 = scalar_lea.vmem %s936_s2, %s525_s28 }
  0x1a   : > { %v232_v2 = vld [vmem:[%s225_s4] sm:$0xff]  ;;  %v233_v3 = vld [vmem:[%s225_s4 + $0x8] sm:$0xff]  ;;  %v234_v4 = vld [vmem:[%s225_s4 + $0x10] sm:$0xff]  ;;  %s514_s8 = sshll.u32 %s215_s26, 3  ;;  %s413_s26 = sshll.u32 %s213_s23, 4  ;;  %s888_s26 = int_to_ptr.vmem [resolvable:$true] %s413_s26 }
  0x1b   : > { %v595_v5 = vpack.c.bf16 %v233_v3, %v232_v2  ;;  %v235_v6 = vld [vmem:[%s225_s4 + $0x18] sm:$0xff]  ;;  %v310_v7 = vld [vmem:[%s851_s7] sm:$0xff]  ;;  %v311_v8 = vld [vmem:[%s851_s7 + $0x8] sm:$0xff]  ;;  %s220_s11 = scalar_lea.vmem %s934_s0, %s514_s8  ;;  %s682_s4 = scalar_lea.vmem %s888_s26, 128 }
  0x1c   : > { %v601_v9 = vpack.c.bf16 %v311_v8, %v310_v7  ;;  %v312_v10 = vld [vmem:[%s851_s7 + $0x10] sm:$0xff]  ;;  %v313_v11 = vld [vmem:[%s851_s7 + $0x18] sm:$0xff]  ;;  %v598_v12 = vpack.c.bf16 %v235_v6, %v234_v4  ;;  %v314_v14 = vld [vmem:[%s851_s7 + $0x20] sm:$0xff]  ;;  %p683_p12 = scmp.ne.s32.totalorder %s888_s26, %s682_s4  ;;  %s686_s5 = sshll.u32 %s765_s15, 4  ;;  %s687_s5 = int_to_ptr.vmem [resolvable:$false] %s686_s5 }
  0x1d   : > { %596 = vmatpush3.bf16.msra.mxu0 %v595_v5  ;;  %v604_v13 = vpack.c.bf16 %v313_v11, %v312_v10  ;;  %v315_v15 = vld [vmem:[%s851_s7 + $0x28] sm:$0xff]  ;;  %v231_v16 = vld [vmem:[%s220_s11] sm:$0xff]  ;;  %v316_v18 = vld [vmem:[%s851_s7 + $0x30] sm:$0xff]  ;;  %s688_s6 = scalar_lea.vmem %s687_s5, 256  ;;  %p689_p1 = scmp.lt.s32.totalorder %s888_s26, %s687_s5 }
  0x1e   : > { %597 = vmatprep.subr.bf16.mxu0 %v762_v0  ;;  %602 = vmatpush3.bf16.msra.mxu1 %v601_v9  ;;  %v607_v17 = vpack.c.bf16 %v315_v15, %v314_v14  ;;  %v317_v19 = vld [vmem:[%s851_s7 + $0x38] sm:$0xff]  ;;  %v318_v21 = vld [vmem:[%s851_s7 + $0x40] sm:$0xff]  ;;  %v319_v22 = vld [vmem:[%s851_s7 + $0x48] sm:$0xff]  ;;  %p684_p13 = pnand %p683_p12, %p826_p4  ;;  %p690_p2 = scmp.lt.s32.totalorder %s688_s6, %s682_s4 }
  0x1f   : > { %603 = vmatprep.subr.bf16.mxu1 %v762_v0  ;;  %v610_v20 = vpack.c.bf16 %v317_v19, %v316_v18  ;;  %v613_v23 = vpack.c.bf16 %v319_v22, %v318_v21  ;;  %v320_v24 = vld [vmem:[%s851_s7 + $0x50] sm:$0xff]  ;;  %v321_v25 = vld [vmem:[%s851_s7 + $0x58] sm:$0xff]  ;;  %v322_v27 = vld [vmem:[%s851_s7 + $0x60] sm:$0xff] }
  0x20   : > { %v616_v26 = vpack.c.bf16 %v321_v25, %v320_v24  ;;  %v323_v28 = vld [vmem:[%s851_s7 + $0x68] sm:$0xff]  ;;  %v324_v30 = vld [vmem:[%s851_s7 + $0x70] sm:$0xff]  ;;  %v325_v31 = vld [vmem:[%s851_s7 + $0x78] sm:$0xff]  ;;  %p685_p0 = pneg %p684_p13  ;;  %p691_p3 = por %p690_p2, %p689_p1 }
  0x21   : > { %599 = vmatpush3.bf16.msra.mxu0 %v598_v12  ;;  %v619_v29 = vpack.c.bf16 %v323_v28, %v322_v27  ;;  %v622_v32 = vpack.c.bf16 %v325_v31, %v324_v30 }
  0x22   : > { %605 = vmatpush3.bf16.msra.mxu1 %v604_v13  ;;  %p692_p5 = pnand %p691_p3, %p685_p0 }
  0x23   : > { %606 = vmatprep.subr.bf16.mxu1 %v762_v0 }
  0x24   : > { %557 = vmatmul.mubr.msk.f32.vlgmr.msra.gmra.mrb[0].mxu0 %vm236_vm1, %v231_v16 }
  0x26   : > { %608 = vmatpush3.bf16.msra.mxu1 %v607_v17 }
  0x27   : > { %609 = vmatprep.subr.bf16.mxu1 %v762_v0 }
  0x2a   : > { %611 = vmatpush3.bf16.msra.mxu1 %v610_v20 }
  0x2b   : > { %612 = vmatprep.subr.bf16.mxu1 %v762_v0 }
  0x2e   : > { %614 = vmatpush3.bf16.msra.mxu1 %v613_v23 }
  0x2f   : > { %615 = vmatprep.subr.bf16.mxu1 %v762_v0 }
  0x32   : > { %617 = vmatpush3.bf16.msra.mxu1 %v616_v26 }
  0x33   : > { %618 = vmatprep.subr.bf16.mxu1 %v762_v0 }
  0x36   : > { %620 = vmatpush3.bf16.msra.mxu1 %v619_v29 }
  0x37   : > { %621 = vmatprep.subr.bf16.mxu1 %v762_v0 }
  0x3a   : > { %623 = vmatpush3.bf16.msra.mxu1 %v622_v32 }
  0xf7   : > { %v306_v33 = vpop.f32.mrb[0].mxu0 }
  0xf8   : > { %v558_v34 = vpop.f32.mrb[1].mxu0  ;;  %592 = vmatmul.mubr.f32.vlgmr.msra.gmra.mrb[0].mxu1 %v306_v33 }
 0x1cb   : > { %v392_v35 = vpop.f32.mrb[0].mxu1 }
 0x1cc   : > { %v396_v36 = vmax.f32 %v392_v35, 0.0  ;;  %v593_v37 = vpop.f32.mrb[1].mxu1 }
 0x1ce   : > { %397 = vst.msk [vmem:[%s213_s23] sm:$0xff] %vm236_vm1, %v396_v36 }
 0x1cf   : > { %695 = shalt.err (!%p692_p5)
}
 0x1d0   : > { %s696_s7 = scalar_lea.hbm %s886_s29, 128  ;;  %s700_s10 = scalar_lea.hbm %s937_s3, 256 }
 0x1d1   : > { %p697_p6 = scmp.ne.s32.totalorder %s886_s29, %s696_s7  ;;  %p701_p10 = scmp.lt.u32.totalorder %s886_s29, %s937_s3 }
 0x1d2   : > { %p702_p11 = scmp.lt.u32.totalorder %s700_s10, %s696_s7  ;;  %p704_p13 = scmp.lt.u32.totalorder %s696_s7, %s886_s29 }
 0x1d3   : > { %p698_p7 = pnand %p697_p6, %p826_p4 }
 0x1d4   : > { %p703_p12 = por %p702_p11, %p701_p10 }
 0x1d5   : > { %p699_p9 = pneg %p698_p7 }
 0x1d6   : > { %p705_p0 = por %p704_p13, %p703_p12 }
 0x1d8   : > { %p706_p1 = pnand %p705_p0, %p699_p9 }
 0x1da   : > { %709 = shalt.err (!%p706_p1)
}
 0x1db   : > { %624 = dma.vmem_to_hbm [thread:$0]  (%p826_p4), %s888_s26, 128, %s886_s29, %s399_s30  }
 0x1dc PF: > { %p630_p2 = scmp.ge.s32.totalorder %s760_s17, 2  ;;  %s425_s19 = sand.u32 1, %s740_s12  }
 0x1dd   : > { %s426_s21 = scalar_lea.sflag [#allocation3], %s425_s19 }
 0x1de   : > { %p627_p3 = pnand %p630_p2, %p833_p8 }
 0x1e0   : > { %735 = dma.done.wait (!%p627_p3), %s426_s21, 128  }
 0x1e1   : > { %737 = vsyncadd (!%p627_p3), %s426_s21, 4294967168  ;;  %s16_s17 = sadd.s32 1, %s760_s17   ;;  %s940_s12 = smov %s744_s13 }
 0x1e2   : > { %p13_p5 = scmp.ge.s32.totalorder %s16_s17, 4   ;;  %s941_s13 = smov %s748_s14 }
 0x1e3   : > { %s942_s14 = smov %s839_s25  ;;  %s943_s15 = smov %s756_s16 }
 0x1e4   : > { %s944_s16 = smov %s946_s20  ;;  %15 = sbr.rel (!%p13_p5) target bundleno = 4 (0x4), region = 73 }
 0x1eb   :  { %431 = vsyncpa [#allocation3], 1 }
 0x1ec   :  { %433 = vsyncpa [#allocation3 + $0x1], 1 }

</bundles_post_ra>
